<compile_context>
chip_gen: v5e
topology: v5e:2x2
jax: 0.10.0
libtpu: 0.0.40
codegen_flags: <defaults>
</compile_context>

<pallas_src>
import jax
import jax.numpy as jnp
import numpy as np
from jax.experimental import pallas as pl
from jax.experimental.pallas import tpu as pltpu

LANE = 128      # TPU lane width (last dim)
SUBLANE = 8     # f32 sublane height (second-to-last dim)


def _ceil_to(x, m):
    return ((x + m - 1) // m) * m


def _pick_tile_v(vp):
    for t in (2048, 1024, 512, 256, 128):
        if vp % t == 0 and t <= vp:
            return t
    return vp


# --------------------------------------------------------------------------- #
# Kernel 1: embedding row gather (manual DMA from HBM) + single GRU step.
# --------------------------------------------------------------------------- #
def gru_kernel(tok_ref, emb_ref, h_ref, wi_ref, wh_ref, bi_ref, bhn_ref,
               hnew_ref, x_vmem, sems):
    f32 = jnp.float32
    bf16 = jnp.bfloat16
    Bp, Hp = hnew_ref.shape

    # ---- true row gather: DMA only the Bp needed embedding rows into VMEM ----
    # tokens live in SMEM (scalar prefetch); table stays in HBM (pl.ANY).
    copies = []
    for b in range(Bp):
        cp = pltpu.make_async_copy(
            emb_ref.at[pl.ds(tok_ref[b], 1), :],    # (1, Ep) row in HBM
            x_vmem.at[pl.ds(b, 1), :],              # (1, Ep) row in VMEM scratch
            sems.at[b])
        cp.start()
        copies.append(cp)
    for cp in copies:
        cp.wait()

    x = x_vmem[...].astype(bf16)                    # (Bp, Ep)
    h = h_ref[...]                                  # (Bp, Hp) f32

    # ---- fused GRU gates: two bf16 matmuls (f32 accumulation) ----
    # bi_ref = [b_ir+b_hr | b_iz+b_hz | b_in] (folded r/z biases)
    gi = jnp.dot(x, wi_ref[...], preferred_element_type=f32) + bi_ref[...]   # (Bp, 3Hp)
    gh = jnp.dot(h.astype(bf16), wh_ref[...], preferred_element_type=f32)    # (Bp, 3Hp)

    r = jax.nn.sigmoid(gi[:, 0 * Hp:1 * Hp] + gh[:, 0 * Hp:1 * Hp])
    z = jax.nn.sigmoid(gi[:, 1 * Hp:2 * Hp] + gh[:, 1 * Hp:2 * Hp])
    n = jnp.tanh(gi[:, 2 * Hp:3 * Hp] + r * (gh[:, 2 * Hp:3 * Hp] + bhn_ref[...]))
    hnew_ref[...] = (1.0 - z) * n + z * h           # PyTorch GRU update


# --------------------------------------------------------------------------- #
# Kernel 2: FC / vocab head, tiled over the vocab dimension ("parallel" grid).
# --------------------------------------------------------------------------- #
def fc_kernel(h_ref, wfc_ref, bfc_ref, pred_ref):
    hb = h_ref[...].astype(jnp.bfloat16)
    pred_ref[...] = (jnp.dot(hb, wfc_ref[...], preferred_element_type=jnp.float32)
                     + bfc_ref[...])


# --------------------------------------------------------------------------- #
# Parameter fusion / padding (done once).
# --------------------------------------------------------------------------- #
def prepare_params(p):
    V, E = p["embedding"].shape
    H = p["W_hr"].shape[0]
    Vp, Ep, Hp = _ceil_to(V, LANE), _ceil_to(E, LANE), _ceil_to(H, LANE)

    def pad2(a, rows, cols):
        a = jnp.asarray(a, jnp.float32)
        return jnp.zeros((rows, cols), jnp.float32).at[:a.shape[0], :a.shape[1]].set(a)

    bf16 = jnp.bfloat16
    fused = {
        # table stays f32: only B rows are streamed per step after the gather
        "emb": pad2(p["embedding"], Vp, Ep),
        # [r | z | n] along the lane dim, each gate padded to Hp — stored bf16
        "W_i": jnp.concatenate([pad2(p["W_ir"], Ep, Hp),
                                pad2(p["W_iz"], Ep, Hp),
                                pad2(p["W_in"], Ep, Hp)], axis=1).astype(bf16),
        "W_h": jnp.concatenate([pad2(p["W_hr"], Hp, Hp),
                                pad2(p["W_hz"], Hp, Hp),
                                pad2(p["W_hn"], Hp, Hp)], axis=1).astype(bf16),
        # fold b_ir+b_hr and b_iz+b_hz; b_in here, b_hn kept separate (r-gated)
        "b_i": jnp.concatenate([pad2(p["b_ir"] + p["b_hr"], 1, Hp),
                                pad2(p["b_iz"] + p["b_hz"], 1, Hp),
                                pad2(p["b_in"], 1, Hp)], axis=1),
        "b_hn": pad2(p["b_hn"], 1, Hp),
        "W_fc": pad2(p["W_fc"], Hp, Vp).astype(bf16),
        "b_fc": pad2(p["b_fc"], 1, Vp),
        "V": V, "E": E, "H": H, "Vp": Vp, "Ep": Ep, "Hp": Hp,
    }
    return fused


# --------------------------------------------------------------------------- #
# Wrapper.
# --------------------------------------------------------------------------- #
def decoder_forward(tokens, hidden, fused):
    """tokens: (B,) int32, hidden: (1, B, H) -> (prediction (B, V), hidden (1, B, H))."""
    B = tokens.shape[0]
    H, V = fused["H"], fused["V"]
    Hp, Vp, Ep = fused["Hp"], fused["Vp"], fused["Ep"]
    Bp = max(_ceil_to(B, SUBLANE), SUBLANE)

    # clamp tokens so the in-kernel DMA gather can never read out of bounds;
    # padded batch rows use token 0 (padding_idx row, sliced off anyway).
    tok_p = jnp.zeros((Bp,), jnp.int32).at[:B].set(
        jnp.clip(tokens.astype(jnp.int32), 0, V - 1))
    h0_p = jnp.zeros((Bp, Hp), jnp.float32).at[:B, :H].set(hidden[0])

    # ---- call 1: embedding gather + fused GRU step ----
    hnew_p = pl.pallas_call(
        gru_kernel,
        out_shape=jax.ShapeDtypeStruct((Bp, Hp), jnp.float32),
        grid_spec=pltpu.PrefetchScalarGridSpec(
            num_scalar_prefetch=1,                      # tokens -> SMEM
            grid=(1,),
            in_specs=[
                pl.BlockSpec(memory_space=pl.ANY),                   # emb stays in HBM
                pl.BlockSpec((Bp, Hp), lambda i, tok: (0, 0)),       # h0
                pl.BlockSpec((Ep, 3 * Hp), lambda i, tok: (0, 0)),   # W_i (bf16)
                pl.BlockSpec((Hp, 3 * Hp), lambda i, tok: (0, 0)),   # W_h (bf16)
                pl.BlockSpec((1, 3 * Hp), lambda i, tok: (0, 0)),    # b_i
                pl.BlockSpec((1, Hp), lambda i, tok: (0, 0)),        # b_hn
            ],
            out_specs=pl.BlockSpec((Bp, Hp), lambda i, tok: (0, 0)),
            scratch_shapes=[pltpu.VMEM((Bp, Ep), jnp.float32),       # gathered x
                            pltpu.SemaphoreType.DMA((Bp,))],
        ),
        compiler_params=pltpu.CompilerParams(dimension_semantics=("arbitrary",)),
    )(tok_p, fused["emb"], h0_p, fused["W_i"], fused["W_h"],
      fused["b_i"], fused["b_hn"])

    # ---- call 2: FC head tiled over vocab (parallel -> dual-TC on v7x) ----
    TV = _pick_tile_v(Vp)
    pred_p = pl.pallas_call(
        fc_kernel,
        out_shape=jax.ShapeDtypeStruct((Bp, Vp), jnp.float32),
        grid=(Vp // TV,),
        in_specs=[pl.BlockSpec((Bp, Hp), lambda j: (0, 0)),
                  pl.BlockSpec((Hp, TV), lambda j: (0, j)),
                  pl.BlockSpec((1, TV), lambda j: (0, j))],
        out_specs=pl.BlockSpec((Bp, TV), lambda j: (0, j)),
        compiler_params=pltpu.CompilerParams(dimension_semantics=("parallel",)),
    )(hnew_p, fused["W_fc"], fused["b_fc"])

    return pred_p[:B, :V], hnew_p[:B, :H][None]      # hidden back to (1, B, H)


# --------------------------------------------------------------------------- #
# Parameter init (PyTorch layout: weights stored transposed, (in_dim, out_dim)).
# --------------------------------------------------------------------------- #
def init_params(key, vocab_size, emb_dim, hidden_dim):
    ks = jax.random.split(key, 16)
    s = 0.1

    def rnd(k, shape):
        return (s * jax.random.normal(k, shape)).astype(jnp.float32)

    emb = rnd(ks[0], (vocab_size, emb_dim))
    emb = emb.at[0].set(0.0)                          # padding_idx=0
    return {
        "embedding": emb,
        "W_ir": rnd(ks[1], (emb_dim, hidden_dim)),
        "W_iz": rnd(ks[2], (emb_dim, hidden_dim)),
        "W_in": rnd(ks[3], (emb_dim, hidden_dim)),
        "W_hr": rnd(ks[4], (hidden_dim, hidden_dim)),
        "W_hz": rnd(ks[5], (hidden_dim, hidden_dim)),
        "W_hn": rnd(ks[6], (hidden_dim, hidden_dim)),
        "b_ir": rnd(ks[7], (1, hidden_dim)),
        "b_iz": rnd(ks[8], (1, hidden_dim)),
        "b_in": rnd(ks[9], (1, hidden_dim)),
        "b_hr": rnd(ks[10], (1, hidden_dim)),
        "b_hz": rnd(ks[11], (1, hidden_dim)),
        "b_hn": rnd(ks[12], (1, hidden_dim)),
        "W_fc": rnd(ks[13], (hidden_dim, vocab_size)),
        "b_fc": rnd(ks[14], (1, vocab_size)),
    }


def decoder_reference(tokens, hidden, p):
    """Pure-JAX reference with PyTorch GRU semantics, mirroring the kernel's
    bf16 weight storage (weights rounded to bf16, f32 accumulation)."""
    def bf(a):
        return jnp.asarray(a, jnp.float32).astype(jnp.bfloat16).astype(jnp.float32)

    x = jnp.take(p["embedding"], tokens, axis=0)
    xb = bf(x)
    h = hidden[0]
    hb = bf(h)
    r = jax.nn.sigmoid(xb @ bf(p["W_ir"]) + p["b_ir"] + hb @ bf(p["W_hr"]) + p["b_hr"])
    z = jax.nn.sigmoid(xb @ bf(p["W_iz"]) + p["b_iz"] + hb @ bf(p["W_hz"]) + p["b_hz"])
    n = jnp.tanh(xb @ bf(p["W_in"]) + p["b_in"] + r * (hb @ bf(p["W_hn"]) + p["b_hn"]))
    h_new = (1.0 - z) * n + z * h
    pred = bf(h_new) @ bf(p["W_fc"]) + p["b_fc"]
    return pred, h_new[None]


if __name__ == "__main__":
    VOCAB, EMB, HID, NLAYERS, BATCH = 32, 16, 32, 1, 4

    key = jax.random.PRNGKey(0)
    k_par, k_tok, k_hid = jax.random.split(key, 3)

    params = init_params(k_par, VOCAB, EMB, HID)
    fused = prepare_params(params)

    tokens = jax.random.randint(k_tok, (BATCH,), 0, VOCAB, dtype=jnp.int32)   # input (B,)
    hidden = (0.1 * jax.random.normal(k_hid, (NLAYERS, BATCH, HID))).astype(jnp.float32)

    pred, h_new = decoder_forward(tokens, hidden, fused)
    jax.block_until_ready((pred, h_new))

    pred_ref, h_ref = decoder_reference(tokens, hidden, params)
    np.testing.assert_allclose(np.asarray(pred), np.asarray(pred_ref), atol=2e-3, rtol=2e-2)
    np.testing.assert_allclose(np.asarray(h_new), np.asarray(h_ref), atol=2e-3, rtol=2e-2)

    assert pred.shape == (BATCH, VOCAB) and h_new.shape == (NLAYERS, BATCH, HID)
    print("KERNEL_OK")
</pallas_src>

<mosaic_0001>
module attributes {stable_mosaic.version = 11 : i64} {
  func.func @gru_kernel(%arg0: i32, %arg1: memref<8xi32, #tpu.memory_space<smem>>, %arg2: memref<128x128xf32, #tpu.memory_space<any>>, %arg3: memref<8x128xf32, #tpu.memory_space<vmem>>, %arg4: memref<128x384xbf16, #tpu.memory_space<vmem>>, %arg5: memref<128x384xbf16, #tpu.memory_space<vmem>>, %arg6: memref<1x384xf32, #tpu.memory_space<vmem>>, %arg7: memref<1x128xf32, #tpu.memory_space<vmem>>, %arg8: memref<8x128xf32, #tpu.memory_space<vmem>>, %arg9: memref<8x128xf32, #tpu.memory_space<vmem>>, %arg10: memref<8x!tpu.dma_semaphore, #tpu.memory_space<semaphore_mem>>) attributes {dimension_semantics = [#tpu.dimension_semantics<arbitrary>], iteration_bounds = array<i64: 1>, scalar_prefetch = 1 : i64, scratch_operands = 2 : i64, tpu.core_type = #tpu.core_type<tc>, window_params = [{}, {pipeline_mode = #tpu.pipeline_mode<synchronous>, transform_indices = @transform_1, window_bounds = array<i64: 8, 128>}, {pipeline_mode = #tpu.pipeline_mode<synchronous>, transform_indices = @transform_2, window_bounds = array<i64: 128, 384>}, {pipeline_mode = #tpu.pipeline_mode<synchronous>, transform_indices = @transform_3, window_bounds = array<i64: 128, 384>}, {pipeline_mode = #tpu.pipeline_mode<synchronous>, transform_indices = @transform_4, window_bounds = array<i64: 1, 384>}, {pipeline_mode = #tpu.pipeline_mode<synchronous>, transform_indices = @transform_5, window_bounds = array<i64: 1, 128>}, {pipeline_mode = #tpu.pipeline_mode<synchronous>, transform_indices = @transform_6, window_bounds = array<i64: 8, 128>}]} {
    %c0 = arith.constant 0 : index
    %0 = memref.load %arg1[%c0] : memref<8xi32, #tpu.memory_space<smem>>
    %c0_i32 = arith.constant 0 : i32
    %c0_i32_0 = arith.constant 0 : i32
    %1 = tpu.memref_slice %arg2[%0, %c0_i32_0] : memref<128x128xf32, #tpu.memory_space<any>> -> memref<1x128xf32, #tpu.memory_space<any>>
    %c0_i32_1 = arith.constant 0 : i32
    %c0_i32_2 = arith.constant 0 : i32
    %2 = tpu.memref_slice %arg9[%c0_i32_1, %c0_i32_2] : memref<8x128xf32, #tpu.memory_space<vmem>> -> memref<1x128xf32, #tpu.memory_space<vmem>>
    %3 = tpu.memref_slice %arg10[%c0_i32] : memref<8x!tpu.dma_semaphore, #tpu.memory_space<semaphore_mem>> -> memref<1x!tpu.dma_semaphore, #tpu.memory_space<semaphore_mem>>
    %4 = tpu.memref_squeeze %3 : memref<1x!tpu.dma_semaphore, #tpu.memory_space<semaphore_mem>> -> memref<!tpu.dma_semaphore, #tpu.memory_space<semaphore_mem>>
    tpu.enqueue_dma source(%1 : memref<1x128xf32, #tpu.memory_space<any>>) target(%2 : memref<1x128xf32, #tpu.memory_space<vmem>>) target_semaphore(%4 : memref<!tpu.dma_semaphore, #tpu.memory_space<semaphore_mem>>)
    %c1 = arith.constant 1 : index
    %5 = memref.load %arg1[%c1] : memref<8xi32, #tpu.memory_space<smem>>
    %c1_i32 = arith.constant 1 : i32
    %c0_i32_3 = arith.constant 0 : i32
    %6 = tpu.memref_slice %arg2[%5, %c0_i32_3] : memref<128x128xf32, #tpu.memory_space<any>> -> memref<1x128xf32, #tpu.memory_space<any>>
    %c1_i32_4 = arith.constant 1 : i32
    %c0_i32_5 = arith.constant 0 : i32
    %7 = tpu.memref_slice %arg9[%c1_i32_4, %c0_i32_5] : memref<8x128xf32, #tpu.memory_space<vmem>> -> memref<1x128xf32, #tpu.memory_space<vmem>>
    %8 = tpu.memref_slice %arg10[%c1_i32] : memref<8x!tpu.dma_semaphore, #tpu.memory_space<semaphore_mem>> -> memref<1x!tpu.dma_semaphore, #tpu.memory_space<semaphore_mem>>
    %9 = tpu.memref_squeeze %8 : memref<1x!tpu.dma_semaphore, #tpu.memory_space<semaphore_mem>> -> memref<!tpu.dma_semaphore, #tpu.memory_space<semaphore_mem>>
    tpu.enqueue_dma source(%6 : memref<1x128xf32, #tpu.memory_space<any>>) target(%7 : memref<1x128xf32, #tpu.memory_space<vmem>>) target_semaphore(%9 : memref<!tpu.dma_semaphore, #tpu.memory_space<semaphore_mem>>)
    %c2 = arith.constant 2 : index
    %10 = memref.load %arg1[%c2] : memref<8xi32, #tpu.memory_space<smem>>
    %c2_i32 = arith.constant 2 : i32
    %c0_i32_6 = arith.constant 0 : i32
    %11 = tpu.memref_slice %arg2[%10, %c0_i32_6] : memref<128x128xf32, #tpu.memory_space<any>> -> memref<1x128xf32, #tpu.memory_space<any>>
    %c2_i32_7 = arith.constant 2 : i32
    %c0_i32_8 = arith.constant 0 : i32
    %12 = tpu.memref_slice %arg9[%c2_i32_7, %c0_i32_8] : memref<8x128xf32, #tpu.memory_space<vmem>> -> memref<1x128xf32, #tpu.memory_space<vmem>>
    %13 = tpu.memref_slice %arg10[%c2_i32] : memref<8x!tpu.dma_semaphore, #tpu.memory_space<semaphore_mem>> -> memref<1x!tpu.dma_semaphore, #tpu.memory_space<semaphore_mem>>
    %14 = tpu.memref_squeeze %13 : memref<1x!tpu.dma_semaphore, #tpu.memory_space<semaphore_mem>> -> memref<!tpu.dma_semaphore, #tpu.memory_space<semaphore_mem>>
    tpu.enqueue_dma source(%11 : memref<1x128xf32, #tpu.memory_space<any>>) target(%12 : memref<1x128xf32, #tpu.memory_space<vmem>>) target_semaphore(%14 : memref<!tpu.dma_semaphore, #tpu.memory_space<semaphore_mem>>)
    %c3 = arith.constant 3 : index
    %15 = memref.load %arg1[%c3] : memref<8xi32, #tpu.memory_space<smem>>
    %c3_i32 = arith.constant 3 : i32
    %c0_i32_9 = arith.constant 0 : i32
    %16 = tpu.memref_slice %arg2[%15, %c0_i32_9] : memref<128x128xf32, #tpu.memory_space<any>> -> memref<1x128xf32, #tpu.memory_space<any>>
    %c3_i32_10 = arith.constant 3 : i32
    %c0_i32_11 = arith.constant 0 : i32
    %17 = tpu.memref_slice %arg9[%c3_i32_10, %c0_i32_11] : memref<8x128xf32, #tpu.memory_space<vmem>> -> memref<1x128xf32, #tpu.memory_space<vmem>>
    %18 = tpu.memref_slice %arg10[%c3_i32] : memref<8x!tpu.dma_semaphore, #tpu.memory_space<semaphore_mem>> -> memref<1x!tpu.dma_semaphore, #tpu.memory_space<semaphore_mem>>
    %19 = tpu.memref_squeeze %18 : memref<1x!tpu.dma_semaphore, #tpu.memory_space<semaphore_mem>> -> memref<!tpu.dma_semaphore, #tpu.memory_space<semaphore_mem>>
    tpu.enqueue_dma source(%16 : memref<1x128xf32, #tpu.memory_space<any>>) target(%17 : memref<1x128xf32, #tpu.memory_space<vmem>>) target_semaphore(%19 : memref<!tpu.dma_semaphore, #tpu.memory_space<semaphore_mem>>)
    %c4 = arith.constant 4 : index
    %20 = memref.load %arg1[%c4] : memref<8xi32, #tpu.memory_space<smem>>
    %c4_i32 = arith.constant 4 : i32
    %c0_i32_12 = arith.constant 0 : i32
    %21 = tpu.memref_slice %arg2[%20, %c0_i32_12] : memref<128x128xf32, #tpu.memory_space<any>> -> memref<1x128xf32, #tpu.memory_space<any>>
    %c4_i32_13 = arith.constant 4 : i32
    %c0_i32_14 = arith.constant 0 : i32
    %22 = tpu.memref_slice %arg9[%c4_i32_13, %c0_i32_14] : memref<8x128xf32, #tpu.memory_space<vmem>> -> memref<1x128xf32, #tpu.memory_space<vmem>>
    %23 = tpu.memref_slice %arg10[%c4_i32] : memref<8x!tpu.dma_semaphore, #tpu.memory_space<semaphore_mem>> -> memref<1x!tpu.dma_semaphore, #tpu.memory_space<semaphore_mem>>
    %24 = tpu.memref_squeeze %23 : memref<1x!tpu.dma_semaphore, #tpu.memory_space<semaphore_mem>> -> memref<!tpu.dma_semaphore, #tpu.memory_space<semaphore_mem>>
    tpu.enqueue_dma source(%21 : memref<1x128xf32, #tpu.memory_space<any>>) target(%22 : memref<1x128xf32, #tpu.memory_space<vmem>>) target_semaphore(%24 : memref<!tpu.dma_semaphore, #tpu.memory_space<semaphore_mem>>)
    %c5 = arith.constant 5 : index
    %25 = memref.load %arg1[%c5] : memref<8xi32, #tpu.memory_space<smem>>
    %c5_i32 = arith.constant 5 : i32
    %c0_i32_15 = arith.constant 0 : i32
    %26 = tpu.memref_slice %arg2[%25, %c0_i32_15] : memref<128x128xf32, #tpu.memory_space<any>> -> memref<1x128xf32, #tpu.memory_space<any>>
    %c5_i32_16 = arith.constant 5 : i32
    %c0_i32_17 = arith.constant 0 : i32
    %27 = tpu.memref_slice %arg9[%c5_i32_16, %c0_i32_17] : memref<8x128xf32, #tpu.memory_space<vmem>> -> memref<1x128xf32, #tpu.memory_space<vmem>>
    %28 = tpu.memref_slice %arg10[%c5_i32] : memref<8x!tpu.dma_semaphore, #tpu.memory_space<semaphore_mem>> -> memref<1x!tpu.dma_semaphore, #tpu.memory_space<semaphore_mem>>
    %29 = tpu.memref_squeeze %28 : memref<1x!tpu.dma_semaphore, #tpu.memory_space<semaphore_mem>> -> memref<!tpu.dma_semaphore, #tpu.memory_space<semaphore_mem>>
    tpu.enqueue_dma source(%26 : memref<1x128xf32, #tpu.memory_space<any>>) target(%27 : memref<1x128xf32, #tpu.memory_space<vmem>>) target_semaphore(%29 : memref<!tpu.dma_semaphore, #tpu.memory_space<semaphore_mem>>)
    %c6 = arith.constant 6 : index
    %30 = memref.load %arg1[%c6] : memref<8xi32, #tpu.memory_space<smem>>
    %c6_i32 = arith.constant 6 : i32
    %c0_i32_18 = arith.constant 0 : i32
    %31 = tpu.memref_slice %arg2[%30, %c0_i32_18] : memref<128x128xf32, #tpu.memory_space<any>> -> memref<1x128xf32, #tpu.memory_space<any>>
    %c6_i32_19 = arith.constant 6 : i32
    %c0_i32_20 = arith.constant 0 : i32
    %32 = tpu.memref_slice %arg9[%c6_i32_19, %c0_i32_20] : memref<8x128xf32, #tpu.memory_space<vmem>> -> memref<1x128xf32, #tpu.memory_space<vmem>>
    %33 = tpu.memref_slice %arg10[%c6_i32] : memref<8x!tpu.dma_semaphore, #tpu.memory_space<semaphore_mem>> -> memref<1x!tpu.dma_semaphore, #tpu.memory_space<semaphore_mem>>
    %34 = tpu.memref_squeeze %33 : memref<1x!tpu.dma_semaphore, #tpu.memory_space<semaphore_mem>> -> memref<!tpu.dma_semaphore, #tpu.memory_space<semaphore_mem>>
    tpu.enqueue_dma source(%31 : memref<1x128xf32, #tpu.memory_space<any>>) target(%32 : memref<1x128xf32, #tpu.memory_space<vmem>>) target_semaphore(%34 : memref<!tpu.dma_semaphore, #tpu.memory_space<semaphore_mem>>)
    %c7 = arith.constant 7 : index
    %35 = memref.load %arg1[%c7] : memref<8xi32, #tpu.memory_space<smem>>
    %c7_i32 = arith.constant 7 : i32
    %c0_i32_21 = arith.constant 0 : i32
    %36 = tpu.memref_slice %arg2[%35, %c0_i32_21] : memref<128x128xf32, #tpu.memory_space<any>> -> memref<1x128xf32, #tpu.memory_space<any>>
    %c7_i32_22 = arith.constant 7 : i32
    %c0_i32_23 = arith.constant 0 : i32
    %37 = tpu.memref_slice %arg9[%c7_i32_22, %c0_i32_23] : memref<8x128xf32, #tpu.memory_space<vmem>> -> memref<1x128xf32, #tpu.memory_space<vmem>>
    %38 = tpu.memref_slice %arg10[%c7_i32] : memref<8x!tpu.dma_semaphore, #tpu.memory_space<semaphore_mem>> -> memref<1x!tpu.dma_semaphore, #tpu.memory_space<semaphore_mem>>
    %39 = tpu.memref_squeeze %38 : memref<1x!tpu.dma_semaphore, #tpu.memory_space<semaphore_mem>> -> memref<!tpu.dma_semaphore, #tpu.memory_space<semaphore_mem>>
    tpu.enqueue_dma source(%36 : memref<1x128xf32, #tpu.memory_space<any>>) target(%37 : memref<1x128xf32, #tpu.memory_space<vmem>>) target_semaphore(%39 : memref<!tpu.dma_semaphore, #tpu.memory_space<semaphore_mem>>)
    %c0_i32_24 = arith.constant 0 : i32
    %c0_i32_25 = arith.constant 0 : i32
    %40 = tpu.memref_slice %arg2[%0, %c0_i32_25] : memref<128x128xf32, #tpu.memory_space<any>> -> memref<1x128xf32, #tpu.memory_space<any>>
    %c0_i32_26 = arith.constant 0 : i32
    %c0_i32_27 = arith.constant 0 : i32
    %41 = tpu.memref_slice %arg9[%c0_i32_26, %c0_i32_27] : memref<8x128xf32, #tpu.memory_space<vmem>> -> memref<1x128xf32, #tpu.memory_space<vmem>>
    %42 = tpu.memref_slice %arg10[%c0_i32_24] : memref<8x!tpu.dma_semaphore, #tpu.memory_space<semaphore_mem>> -> memref<1x!tpu.dma_semaphore, #tpu.memory_space<semaphore_mem>>
    %43 = tpu.memref_squeeze %42 : memref<1x!tpu.dma_semaphore, #tpu.memory_space<semaphore_mem>> -> memref<!tpu.dma_semaphore, #tpu.memory_space<semaphore_mem>>
    tpu.wait_dma2 semaphore(%43 : memref<!tpu.dma_semaphore, #tpu.memory_space<semaphore_mem>>) src(%40 : memref<1x128xf32, #tpu.memory_space<any>>) dst(%41 : memref<1x128xf32, #tpu.memory_space<vmem>>)
    %c1_i32_28 = arith.constant 1 : i32
    %c0_i32_29 = arith.constant 0 : i32
    %44 = tpu.memref_slice %arg2[%5, %c0_i32_29] : memref<128x128xf32, #tpu.memory_space<any>> -> memref<1x128xf32, #tpu.memory_space<any>>
    %c1_i32_30 = arith.constant 1 : i32
    %c0_i32_31 = arith.constant 0 : i32
    %45 = tpu.memref_slice %arg9[%c1_i32_30, %c0_i32_31] : memref<8x128xf32, #tpu.memory_space<vmem>> -> memref<1x128xf32, #tpu.memory_space<vmem>>
    %46 = tpu.memref_slice %arg10[%c1_i32_28] : memref<8x!tpu.dma_semaphore, #tpu.memory_space<semaphore_mem>> -> memref<1x!tpu.dma_semaphore, #tpu.memory_space<semaphore_mem>>
    %47 = tpu.memref_squeeze %46 : memref<1x!tpu.dma_semaphore, #tpu.memory_space<semaphore_mem>> -> memref<!tpu.dma_semaphore, #tpu.memory_space<semaphore_mem>>
    tpu.wait_dma2 semaphore(%47 : memref<!tpu.dma_semaphore, #tpu.memory_space<semaphore_mem>>) src(%44 : memref<1x128xf32, #tpu.memory_space<any>>) dst(%45 : memref<1x128xf32, #tpu.memory_space<vmem>>)
    %c2_i32_32 = arith.constant 2 : i32
    %c0_i32_33 = arith.constant 0 : i32
    %48 = tpu.memref_slice %arg2[%10, %c0_i32_33] : memref<128x128xf32, #tpu.memory_space<any>> -> memref<1x128xf32, #tpu.memory_space<any>>
    %c2_i32_34 = arith.constant 2 : i32
    %c0_i32_35 = arith.constant 0 : i32
    %49 = tpu.memref_slice %arg9[%c2_i32_34, %c0_i32_35] : memref<8x128xf32, #tpu.memory_space<vmem>> -> memref<1x128xf32, #tpu.memory_space<vmem>>
    %50 = tpu.memref_slice %arg10[%c2_i32_32] : memref<8x!tpu.dma_semaphore, #tpu.memory_space<semaphore_mem>> -> memref<1x!tpu.dma_semaphore, #tpu.memory_space<semaphore_mem>>
    %51 = tpu.memref_squeeze %50 : memref<1x!tpu.dma_semaphore, #tpu.memory_space<semaphore_mem>> -> memref<!tpu.dma_semaphore, #tpu.memory_space<semaphore_mem>>
    tpu.wait_dma2 semaphore(%51 : memref<!tpu.dma_semaphore, #tpu.memory_space<semaphore_mem>>) src(%48 : memref<1x128xf32, #tpu.memory_space<any>>) dst(%49 : memref<1x128xf32, #tpu.memory_space<vmem>>)
    %c3_i32_36 = arith.constant 3 : i32
    %c0_i32_37 = arith.constant 0 : i32
    %52 = tpu.memref_slice %arg2[%15, %c0_i32_37] : memref<128x128xf32, #tpu.memory_space<any>> -> memref<1x128xf32, #tpu.memory_space<any>>
    %c3_i32_38 = arith.constant 3 : i32
    %c0_i32_39 = arith.constant 0 : i32
    %53 = tpu.memref_slice %arg9[%c3_i32_38, %c0_i32_39] : memref<8x128xf32, #tpu.memory_space<vmem>> -> memref<1x128xf32, #tpu.memory_space<vmem>>
    %54 = tpu.memref_slice %arg10[%c3_i32_36] : memref<8x!tpu.dma_semaphore, #tpu.memory_space<semaphore_mem>> -> memref<1x!tpu.dma_semaphore, #tpu.memory_space<semaphore_mem>>
    %55 = tpu.memref_squeeze %54 : memref<1x!tpu.dma_semaphore, #tpu.memory_space<semaphore_mem>> -> memref<!tpu.dma_semaphore, #tpu.memory_space<semaphore_mem>>
    tpu.wait_dma2 semaphore(%55 : memref<!tpu.dma_semaphore, #tpu.memory_space<semaphore_mem>>) src(%52 : memref<1x128xf32, #tpu.memory_space<any>>) dst(%53 : memref<1x128xf32, #tpu.memory_space<vmem>>)
    %c4_i32_40 = arith.constant 4 : i32
    %c0_i32_41 = arith.constant 0 : i32
    %56 = tpu.memref_slice %arg2[%20, %c0_i32_41] : memref<128x128xf32, #tpu.memory_space<any>> -> memref<1x128xf32, #tpu.memory_space<any>>
    %c4_i32_42 = arith.constant 4 : i32
    %c0_i32_43 = arith.constant 0 : i32
    %57 = tpu.memref_slice %arg9[%c4_i32_42, %c0_i32_43] : memref<8x128xf32, #tpu.memory_space<vmem>> -> memref<1x128xf32, #tpu.memory_space<vmem>>
    %58 = tpu.memref_slice %arg10[%c4_i32_40] : memref<8x!tpu.dma_semaphore, #tpu.memory_space<semaphore_mem>> -> memref<1x!tpu.dma_semaphore, #tpu.memory_space<semaphore_mem>>
    %59 = tpu.memref_squeeze %58 : memref<1x!tpu.dma_semaphore, #tpu.memory_space<semaphore_mem>> -> memref<!tpu.dma_semaphore, #tpu.memory_space<semaphore_mem>>
    tpu.wait_dma2 semaphore(%59 : memref<!tpu.dma_semaphore, #tpu.memory_space<semaphore_mem>>) src(%56 : memref<1x128xf32, #tpu.memory_space<any>>) dst(%57 : memref<1x128xf32, #tpu.memory_space<vmem>>)
    %c5_i32_44 = arith.constant 5 : i32
    %c0_i32_45 = arith.constant 0 : i32
    %60 = tpu.memref_slice %arg2[%25, %c0_i32_45] : memref<128x128xf32, #tpu.memory_space<any>> -> memref<1x128xf32, #tpu.memory_space<any>>
    %c5_i32_46 = arith.constant 5 : i32
    %c0_i32_47 = arith.constant 0 : i32
    %61 = tpu.memref_slice %arg9[%c5_i32_46, %c0_i32_47] : memref<8x128xf32, #tpu.memory_space<vmem>> -> memref<1x128xf32, #tpu.memory_space<vmem>>
    %62 = tpu.memref_slice %arg10[%c5_i32_44] : memref<8x!tpu.dma_semaphore, #tpu.memory_space<semaphore_mem>> -> memref<1x!tpu.dma_semaphore, #tpu.memory_space<semaphore_mem>>
    %63 = tpu.memref_squeeze %62 : memref<1x!tpu.dma_semaphore, #tpu.memory_space<semaphore_mem>> -> memref<!tpu.dma_semaphore, #tpu.memory_space<semaphore_mem>>
    tpu.wait_dma2 semaphore(%63 : memref<!tpu.dma_semaphore, #tpu.memory_space<semaphore_mem>>) src(%60 : memref<1x128xf32, #tpu.memory_space<any>>) dst(%61 : memref<1x128xf32, #tpu.memory_space<vmem>>)
    %c6_i32_48 = arith.constant 6 : i32
    %c0_i32_49 = arith.constant 0 : i32
    %64 = tpu.memref_slice %arg2[%30, %c0_i32_49] : memref<128x128xf32, #tpu.memory_space<any>> -> memref<1x128xf32, #tpu.memory_space<any>>
    %c6_i32_50 = arith.constant 6 : i32
    %c0_i32_51 = arith.constant 0 : i32
    %65 = tpu.memref_slice %arg9[%c6_i32_50, %c0_i32_51] : memref<8x128xf32, #tpu.memory_space<vmem>> -> memref<1x128xf32, #tpu.memory_space<vmem>>
    %66 = tpu.memref_slice %arg10[%c6_i32_48] : memref<8x!tpu.dma_semaphore, #tpu.memory_space<semaphore_mem>> -> memref<1x!tpu.dma_semaphore, #tpu.memory_space<semaphore_mem>>
    %67 = tpu.memref_squeeze %66 : memref<1x!tpu.dma_semaphore, #tpu.memory_space<semaphore_mem>> -> memref<!tpu.dma_semaphore, #tpu.memory_space<semaphore_mem>>
    tpu.wait_dma2 semaphore(%67 : memref<!tpu.dma_semaphore, #tpu.memory_space<semaphore_mem>>) src(%64 : memref<1x128xf32, #tpu.memory_space<any>>) dst(%65 : memref<1x128xf32, #tpu.memory_space<vmem>>)
    %c7_i32_52 = arith.constant 7 : i32
    %c0_i32_53 = arith.constant 0 : i32
    %68 = tpu.memref_slice %arg2[%35, %c0_i32_53] : memref<128x128xf32, #tpu.memory_space<any>> -> memref<1x128xf32, #tpu.memory_space<any>>
    %c7_i32_54 = arith.constant 7 : i32
    %c0_i32_55 = arith.constant 0 : i32
    %69 = tpu.memref_slice %arg9[%c7_i32_54, %c0_i32_55] : memref<8x128xf32, #tpu.memory_space<vmem>> -> memref<1x128xf32, #tpu.memory_space<vmem>>
    %70 = tpu.memref_slice %arg10[%c7_i32_52] : memref<8x!tpu.dma_semaphore, #tpu.memory_space<semaphore_mem>> -> memref<1x!tpu.dma_semaphore, #tpu.memory_space<semaphore_mem>>
    %71 = tpu.memref_squeeze %70 : memref<1x!tpu.dma_semaphore, #tpu.memory_space<semaphore_mem>> -> memref<!tpu.dma_semaphore, #tpu.memory_space<semaphore_mem>>
    tpu.wait_dma2 semaphore(%71 : memref<!tpu.dma_semaphore, #tpu.memory_space<semaphore_mem>>) src(%68 : memref<1x128xf32, #tpu.memory_space<any>>) dst(%69 : memref<1x128xf32, #tpu.memory_space<vmem>>)
    %c0_56 = arith.constant 0 : index
    %c0_57 = arith.constant 0 : index
    %72 = vector.load %arg9[%c0_56, %c0_57] : memref<8x128xf32, #tpu.memory_space<vmem>>, vector<8x128xf32>
    %73 = arith.truncf %72 : vector<8x128xf32> to vector<8x128xbf16>
    %c0_58 = arith.constant 0 : index
    %c0_59 = arith.constant 0 : index
    %74 = vector.load %arg3[%c0_58, %c0_59] : memref<8x128xf32, #tpu.memory_space<vmem>>, vector<8x128xf32>
    %c0_60 = arith.constant 0 : index
    %c0_61 = arith.constant 0 : index
    %75 = vector.load %arg4[%c0_60, %c0_61] : memref<128x384xbf16, #tpu.memory_space<vmem>>, vector<128x384xbf16>
    %cst = arith.constant dense<0.000000e+00> : vector<8x384xf32>
    %76 = tpu.matmul %73, %75, %cst {dimension_numbers = #tpu.dot_dimension_numbers<[1], [0], [0], [1], [0, 0, 1, 1], [], []>} : vector<8x128xbf16>, vector<128x384xbf16>, vector<8x384xf32> -> vector<8x384xf32>
    %c0_62 = arith.constant 0 : index
    %c0_63 = arith.constant 0 : index
    %77 = vector.load %arg6[%c0_62, %c0_63] : memref<1x384xf32, #tpu.memory_space<vmem>>, vector<1x384xf32>
    %78 = vector.broadcast %77 : vector<1x384xf32> to vector<8x384xf32>
    %79 = arith.addf %76, %78 : vector<8x384xf32>
    %80 = arith.truncf %74 : vector<8x128xf32> to vector<8x128xbf16>
    %c0_64 = arith.constant 0 : index
    %c0_65 = arith.constant 0 : index
    %81 = vector.load %arg5[%c0_64, %c0_65] : memref<128x384xbf16, #tpu.memory_space<vmem>>, vector<128x384xbf16>
    %cst_66 = arith.constant dense<0.000000e+00> : vector<8x384xf32>
    %82 = tpu.matmul %80, %81, %cst_66 {dimension_numbers = #tpu.dot_dimension_numbers<[1], [0], [0], [1], [0, 0, 1, 1], [], []>} : vector<8x128xbf16>, vector<128x384xbf16>, vector<8x384xf32> -> vector<8x384xf32>
    %83 = vector.extract_strided_slice %79 {offsets = [0, 0], sizes = [8, 128], strides = [1, 1]} : vector<8x384xf32> to vector<8x128xf32>
    %84 = vector.extract_strided_slice %82 {offsets = [0, 0], sizes = [8, 128], strides = [1, 1]} : vector<8x384xf32> to vector<8x128xf32>
    %85 = arith.addf %83, %84 : vector<8x128xf32>
    %86 = arith.negf %85 : vector<8x128xf32>
    %87 = math.exp %86 : vector<8x128xf32>
    %cst_67 = arith.constant 1.000000e+00 : f32
    %88 = vector.broadcast %cst_67 : f32 to vector<8x128xf32>
    %89 = arith.addf %88, %87 : vector<8x128xf32>
    %90 = arith.divf %88, %89 : vector<8x128xf32>
    %91 = vector.extract_strided_slice %79 {offsets = [0, 128], sizes = [8, 128], strides = [1, 1]} : vector<8x384xf32> to vector<8x128xf32>
    %92 = vector.extract_strided_slice %82 {offsets = [0, 128], sizes = [8, 128], strides = [1, 1]} : vector<8x384xf32> to vector<8x128xf32>
    %93 = arith.addf %91, %92 : vector<8x128xf32>
    %94 = arith.negf %93 : vector<8x128xf32>
    %95 = math.exp %94 : vector<8x128xf32>
    %cst_68 = arith.constant 1.000000e+00 : f32
    %96 = vector.broadcast %cst_68 : f32 to vector<8x128xf32>
    %97 = arith.addf %96, %95 : vector<8x128xf32>
    %98 = arith.divf %96, %97 : vector<8x128xf32>
    %99 = vector.extract_strided_slice %79 {offsets = [0, 256], sizes = [8, 128], strides = [1, 1]} : vector<8x384xf32> to vector<8x128xf32>
    %100 = vector.extract_strided_slice %82 {offsets = [0, 256], sizes = [8, 128], strides = [1, 1]} : vector<8x384xf32> to vector<8x128xf32>
    %c0_69 = arith.constant 0 : index
    %c0_70 = arith.constant 0 : index
    %101 = vector.load %arg7[%c0_69, %c0_70] : memref<1x128xf32, #tpu.memory_space<vmem>>, vector<1x128xf32>
    %102 = vector.broadcast %101 : vector<1x128xf32> to vector<8x128xf32>
    %103 = arith.addf %100, %102 : vector<8x128xf32>
    %104 = arith.mulf %90, %103 : vector<8x128xf32>
    %105 = arith.addf %99, %104 : vector<8x128xf32>
    %106 = math.tanh %105 : vector<8x128xf32>
    %cst_71 = arith.constant 1.000000e+00 : f32
    %107 = vector.broadcast %cst_71 : f32 to vector<8x128xf32>
    %108 = arith.subf %107, %98 : vector<8x128xf32>
    %109 = arith.mulf %108, %106 : vector<8x128xf32>
    %110 = arith.mulf %98, %74 : vector<8x128xf32>
    %111 = arith.addf %109, %110 : vector<8x128xf32>
    %c0_72 = arith.constant 0 : index
    %c0_73 = arith.constant 0 : index
    %112 = vector.load %arg8[%c0_72, %c0_73] : memref<8x128xf32, #tpu.memory_space<vmem>>, vector<8x128xf32>
    tpu.vector_store %arg8[%c0_72, %c0_73], %111 {strides = array<i32>} : memref<8x128xf32, #tpu.memory_space<vmem>>, vector<8x128xf32>,
    return
  }
  func.func @transform_1(%arg0: i32, %arg1: memref<8xi32, #tpu.memory_space<smem>>) -> (i32, i32) {
    %c0_i32 = arith.constant 0 : i32
    %c0_i32_0 = arith.constant 0 : i32
    %c0_i32_1 = arith.constant 0 : i32
    return %c0_i32, %c0_i32_0 : i32, i32
  }
  func.func @transform_2(%arg0: i32, %arg1: memref<8xi32, #tpu.memory_space<smem>>) -> (i32, i32) {
    %c0_i32 = arith.constant 0 : i32
    %c0_i32_0 = arith.constant 0 : i32
    %c0_i32_1 = arith.constant 0 : i32
    return %c0_i32, %c0_i32_0 : i32, i32
  }
  func.func @transform_3(%arg0: i32, %arg1: memref<8xi32, #tpu.memory_space<smem>>) -> (i32, i32) {
    %c0_i32 = arith.constant 0 : i32
    %c0_i32_0 = arith.constant 0 : i32
    %c0_i32_1 = arith.constant 0 : i32
    return %c0_i32, %c0_i32_0 : i32, i32
  }
  func.func @transform_4(%arg0: i32, %arg1: memref<8xi32, #tpu.memory_space<smem>>) -> (i32, i32) {
    %c0_i32 = arith.constant 0 : i32
    %c0_i32_0 = arith.constant 0 : i32
    %c0_i32_1 = arith.constant 0 : i32
    return %c0_i32, %c0_i32_0 : i32, i32
  }
  func.func @transform_5(%arg0: i32, %arg1: memref<8xi32, #tpu.memory_space<smem>>) -> (i32, i32) {
    %c0_i32 = arith.constant 0 : i32
    %c0_i32_0 = arith.constant 0 : i32
    %c0_i32_1 = arith.constant 0 : i32
    return %c0_i32, %c0_i32_0 : i32, i32
  }
  func.func @transform_6(%arg0: i32, %arg1: memref<8xi32, #tpu.memory_space<smem>>) -> (i32, i32) {
    %c0_i32 = arith.constant 0 : i32
    %c0_i32_0 = arith.constant 0 : i32
    %c0_i32_1 = arith.constant 0 : i32
    return %c0_i32, %c0_i32_0 : i32, i32
  }
}

</mosaic_0001>

<bundles_post_ra>
// kernel: tpu_custom_call.1
= control target key start
LH: loop header
LB: loop body
LE: loop exit
PB: predicated region body
PF: predicated region fallthrough
CT: control target
= control target key end

     0   :  { %s1378_s27 = smov [#allocation5]   ;;  %s1568_s0 = inlined_call_operand.hbm [shape: s32[8], index: 0, kind: input, shape index: {}]   ;;  %s1569_s1 = inlined_call_operand.hbm [shape: f32[128,128], index: 1, kind: input, shape index: {}]   ;;  %s1570_s2 = inlined_call_operand.hbm [shape: f32[8,128], index: 2, kind: input, shape index: {}]   ;;  %s1571_s3 = inlined_call_operand.hbm [shape: bf16[128,384], index: 3, kind: input, shape index: {}]   ;;  %s1572_s4 = inlined_call_operand.hbm [shape: bf16[128,384], index: 4, kind: input, shape index: {}]   ;;  %s1573_s5 = inlined_call_operand.vmem [shape: f32[1,384], index: 5, kind: input, shape index: {}]   ;;  %s1574_s6 = inlined_call_operand.vmem [shape: f32[1,128], index: 6, kind: input, shape index: {}]   ;;  %s1575_s7 = inlined_call_operand.hbm [shape: f32[8,128], index: 7, kind: output, shape index: {}]  }
   0x1   :  { %s13_s26 = sshll.u32 %s1568_s0, 4  ;;  %s14_s26 = int_to_ptr.hbm [resolvable:$true] %s13_s26 }
   0x2   :  { %16 = dma.hbm_to_smem %s14_s26, 16, %s1378_s27, [#allocation4] }
   0x3   :  { %1354 = dma.done.wait [#allocation4], 16 }
   0x4   :  { %1355 = vsyncadd [#allocation4], 4294967280 }
   0x5   :  { %19 = sfence }
   0x6   :  { %20 = vsyncpa [#allocation7], 0 }
   0x7   :  { %21 = vsyncpa [#allocation10], 0  ;;  %s38_s30 = sshll.u32 %s1571_s3, 4  ;;  %s39_s30 = int_to_ptr.hbm [resolvable:$true] %s38_s30 }
   0x8   :  { %22 = vsyncpa [#allocation8], 0  ;;  %s1379_s8 = smov [#allocation9]   ;;  %s28_s0 = sshll.u32 %s1570_s2, 4  ;;  %s29_s0 = int_to_ptr.hbm [resolvable:$true] %s28_s0 }
   0x9   :  { %s40_s9 = sshll.u32 %s1379_s8, 4  ;;  %s1380_s12 = smov 192   ;;  %s41_s9 = int_to_ptr.vmem [resolvable:$true] %s40_s9 }
   0xa   :  { %s1381_s13 = smov 12   ;;  %s1382_s14 = smov [#allocation6]  }
   0xb   :  { %46 = dma.hbm_to_vmem [thread:$0]  %s39_s30, 3072, %s41_s9, [#allocation10], %s1380_s12, %s1380_s12, %s1381_s13  }
   0xc   :  { %s30_s15 = sshll.u32 %s1382_s14, 4  ;;  %s51_s18 = sshll.u32 %s1572_s4, 4  ;;  %s31_s15 = int_to_ptr.vmem [resolvable:$true] %s30_s15  ;;  %s52_s18 = int_to_ptr.hbm [resolvable:$true] %s51_s18 }
   0xd   :  { %33 = dma.hbm_to_vmem [thread:$0]  %s29_s0, 128, %s31_s15, [#allocation7]  }
   0xe   :  { %s1383_s3 = smov [#allocation11]  }
   0xf   :  { %s53_s19 = sshll.u32 %s1383_s3, 4  ;;  %s54_s19 = int_to_ptr.vmem [resolvable:$true] %s53_s19 }
  0x10   :  { %59 = dma.hbm_to_vmem [thread:$0]  %s52_s18, 3072, %s54_s19, [#allocation10], %s1380_s12, %s1380_s12, %s1381_s13  }
  0x11   :  { %1356 = dma.done.wait [#allocation7], 128  }
  0x12   :  { %1357 = vsyncadd [#allocation7], 4294967168 }
  0x13   :  { %1358 = dma.done.wait [#allocation10], 6144  }
  0x14   :  { %1359 = vsyncadd [#allocation10], 4294961152  ;;  %s76_s2 = sld [smem:[#allocation5]]  ;;  %s1384_s20 = smov [#allocation2]  }
  0x15   :  { %s1445_s21 = sshll.u32 %s1384_s20, 4  ;;  %s771_s22 = sld [smem:[#allocation5 + $0x1]]  ;;  %s88_s21 = int_to_ptr.vmem [resolvable:$true] %s1445_s21 }
  0x16   :  { %s1385_s23 = smov [#allocation2 + $0x1]   ;;  %s1450_s24 = sld [smem:[#allocation5 + $0x2]] }
  0x17   :  { %s1448_s4 = sshll.u32 %s1385_s23, 4  ;;  %s1386_s25 = smov [#allocation2 + $0x2]   ;;  %s105_s4 = int_to_ptr.vmem [resolvable:$true] %s1448_s4 }
  0x18   :  { %s1453_s26 = sshll.u32 %s1386_s25, 4  ;;  %s1455_s27 = sld [smem:[#allocation5 + $0x3]]  ;;  %s122_s26 = int_to_ptr.vmem [resolvable:$true] %s1453_s26 }
  0x19   :  { %s1387_s8 = smov [#allocation2 + $0x3]   ;;  %s1469_s18 = scalar_lea.hbm %s1569_s1, 128 }
  0x1a   :  { %s77_s30 = scalar_lea.hbm %s1569_s1, %s76_s2  ;;  %s1461_s9 = sshll.u32 %s1387_s8, 4  ;;  %s139_s9 = int_to_ptr.vmem [resolvable:$true] %s1461_s9 }
  0x1b   :  { %s85_s10 = sshll.u32 %s77_s30, 4  ;;  %s92_s12 = scalar_lea.hbm %s1569_s1, %s771_s22  ;;  %s86_s10 = int_to_ptr.hbm [resolvable:$true] %s85_s10 }
  0x1c   :  { %s102_s13 = sshll.u32 %s92_s12, 4  ;;  %s1138_s14 = sshra.s32 %s86_s10, 4  ;;  %s1139_s14 = int_to_ptr.hbm [resolvable:$true] %s1138_s14  ;;  %s103_s13 = int_to_ptr.hbm [resolvable:$true] %s102_s13 }
  0x1d   :  { %s1140_s15 = scalar_lea.hbm %s1139_s14, 1  ;;  %p1143_p1 = scmp.lt.s32.totalorder %s1139_s14, %s1569_s1 }
  0x1e   :  { %p1141_p0 = scmp.ne.s32.totalorder %s1139_s14, %s1140_s15  ;;  %p1144_p2 = scmp.lt.s32.totalorder %s1469_s18, %s1140_s15 }
  0x20   :  { %p1145_p3 = por %p1144_p2, %p1143_p1 }
  0x22   :  { %p1146_p4 = pnand %p1145_p3, %p1141_p0 }
  0x24   :  { %1149 = shalt.err (!%p1146_p4)  }
  0x25   :  { %90 = dma.hbm_to_vmem [thread:$0]  %s86_s10, 16, %s88_s21, [#allocation3] }
  0x26   :  { %s109_s22 = scalar_lea.hbm %s1569_s1, %s1450_s24  ;;  %s1162_s23 = sshra.s32 %s103_s13, 4  ;;  %s1163_s23 = int_to_ptr.hbm [resolvable:$true] %s1162_s23 }
  0x27   :  { %s1164_s25 = scalar_lea.hbm %s1163_s23, 1  ;;  %p1167_p6 = scmp.lt.s32.totalorder %s1163_s23, %s1569_s1 }
  0x28   :  { %p1165_p5 = scmp.ne.s32.totalorder %s1163_s23, %s1164_s25  ;;  %p1168_p7 = scmp.lt.s32.totalorder %s1469_s18, %s1164_s25 }
  0x2a   :  { %p1169_p8 = por %p1168_p7, %p1167_p6 }
  0x2c   :  { %p1170_p9 = pnand %p1169_p8, %p1165_p5 }
  0x2e   :  { %1173 = shalt.err (!%p1170_p9)  }
  0x2f   :  { %107 = dma.hbm_to_vmem [thread:$0]  %s103_s13, 16, %s105_s4, [#allocation3 + $0x1] }
  0x30   :  { %s119_s21 = sshll.u32 %s109_s22, 4  ;;  %s126_s8 = scalar_lea.hbm %s1569_s1, %s1455_s27  ;;  %s120_s21 = int_to_ptr.hbm [resolvable:$true] %s119_s21 }
  0x31   :  { %s136_s10 = sshll.u32 %s126_s8, 4  ;;  %s1186_s11 = sshra.s32 %s120_s21, 4  ;;  %s1187_s11 = int_to_ptr.hbm [resolvable:$true] %s1186_s11  ;;  %s137_s10 = int_to_ptr.hbm [resolvable:$true] %s136_s10 }
  0x32   :  { %s1188_s0 = scalar_lea.hbm %s1187_s11, 1  ;;  %p1191_p11 = scmp.lt.s32.totalorder %s1187_s11, %s1569_s1 }
  0x33   :  { %p1189_p10 = scmp.ne.s32.totalorder %s1187_s11, %s1188_s0  ;;  %p1192_p12 = scmp.lt.s32.totalorder %s1469_s18, %s1188_s0 }
  0x35   :  { %p1193_p13 = por %p1192_p12, %p1191_p11 }
  0x37   :  { %p1194_p0 = pnand %p1193_p13, %p1189_p10 }
  0x39   :  { %1197 = shalt.err (!%p1194_p0)  }
  0x3a   :  { %124 = dma.hbm_to_vmem [thread:$0]  %s120_s21, 16, %s122_s26, [#allocation3 + $0x2] }
  0x3b   :  { %s1210_s4 = sshra.s32 %s137_s10, 4  ;;  %s1211_s4 = int_to_ptr.hbm [resolvable:$true] %s1210_s4 }
  0x3c   :  { %s1212_s27 = scalar_lea.hbm %s1211_s4, 1  ;;  %p1215_p2 = scmp.lt.s32.totalorder %s1211_s4, %s1569_s1 }
  0x3d   :  { %p1213_p1 = scmp.ne.s32.totalorder %s1211_s4, %s1212_s27  ;;  %p1216_p3 = scmp.lt.s32.totalorder %s1469_s18, %s1212_s27 }
  0x3f   :  { %p1217_p4 = por %p1216_p3, %p1215_p2 }
  0x41   :  { %p1218_p5 = pnand %p1217_p4, %p1213_p1 }
  0x43   :  { %1221 = shalt.err (!%p1218_p5)  }
  0x44   :  { %141 = dma.hbm_to_vmem [thread:$0]  %s137_s10, 16, %s139_s9, [#allocation3 + $0x3] }
  0x45   :  { %s774_s16 = sld [smem:[#allocation5 + $0x4]]  ;;  %s1388_s17 = smov [#allocation2 + $0x4]  }
  0x46   :  { %s155_s3 = sshll.u32 %s1388_s17, 4  ;;  %s775_s19 = sld [smem:[#allocation5 + $0x5]]  ;;  %s156_s3 = int_to_ptr.vmem [resolvable:$true] %s155_s3 }
  0x47   :  { %s1389_s26 = smov [#allocation2 + $0x5]   ;;  %s1502_s20 = sld [smem:[#allocation5 + $0x6]] }
  0x48   :  { %s1500_s2 = sshll.u32 %s1389_s26, 4  ;;  %s1390_s22 = smov [#allocation2 + $0x6]   ;;  %s173_s2 = int_to_ptr.vmem [resolvable:$true] %s1500_s2 }
  0x49   :  { %s1505_s23 = sshll.u32 %s1390_s22, 4  ;;  %s1507_s25 = sld [smem:[#allocation5 + $0x7]]  ;;  %s190_s23 = int_to_ptr.vmem [resolvable:$true] %s1505_s23 }
  0x4b   :  { %s143_s29 = scalar_lea.hbm %s1569_s1, %s774_s16 }
  0x4c   :  { %s153_s21 = sshll.u32 %s143_s29, 4  ;;  %s160_s8 = scalar_lea.hbm %s1569_s1, %s775_s19  ;;  %s154_s21 = int_to_ptr.hbm [resolvable:$true] %s153_s21 }
  0x4d   :  { %s170_s10 = sshll.u32 %s160_s8, 4  ;;  %s1234_s11 = sshra.s32 %s154_s21, 4  ;;  %s1235_s11 = int_to_ptr.hbm [resolvable:$true] %s1234_s11  ;;  %s171_s10 = int_to_ptr.hbm [resolvable:$true] %s170_s10 }
  0x4e   :  { %s1236_s0 = scalar_lea.hbm %s1235_s11, 1  ;;  %p1239_p7 = scmp.lt.s32.totalorder %s1235_s11, %s1569_s1 }
  0x4f   :  { %p1237_p6 = scmp.ne.s32.totalorder %s1235_s11, %s1236_s0  ;;  %p1240_p8 = scmp.lt.s32.totalorder %s1469_s18, %s1236_s0 }
  0x51   :  { %p1241_p9 = por %p1240_p8, %p1239_p7 }
  0x53   :  { %p1242_p10 = pnand %p1241_p9, %p1237_p6 }
  0x55   :  { %1245 = shalt.err (!%p1242_p10)  }
  0x56   :  { %158 = dma.hbm_to_vmem [thread:$0]  %s154_s21, 16, %s156_s3, [#allocation3 + $0x4] }
  0x57   :  { %s177_s13 = scalar_lea.hbm %s1569_s1, %s1502_s20  ;;  %s1258_s15 = sshra.s32 %s171_s10, 4  ;;  %s1259_s15 = int_to_ptr.hbm [resolvable:$true] %s1258_s15 }
  0x58   :  { %s1260_s16 = scalar_lea.hbm %s1259_s15, 1  ;;  %p1263_p12 = scmp.lt.s32.totalorder %s1259_s15, %s1569_s1 }
  0x59   :  { %p1261_p11 = scmp.ne.s32.totalorder %s1259_s15, %s1260_s16  ;;  %p1264_p13 = scmp.lt.s32.totalorder %s1469_s18, %s1260_s16 }
  0x5b   :  { %p1265_p0 = por %p1264_p13, %p1263_p12 }
  0x5d   :  { %p1266_p1 = pnand %p1265_p0, %p1261_p11 }
  0x5f   :  { %1269 = shalt.err (!%p1266_p1)  }
  0x60   :  { %175 = dma.hbm_to_vmem [thread:$0]  %s171_s10, 16, %s173_s2, [#allocation3 + $0x5] }
  0x61   :  { %s187_s3 = sshll.u32 %s177_s13, 4  ;;  %s194_s22 = scalar_lea.hbm %s1569_s1, %s1507_s25  ;;  %s188_s3 = int_to_ptr.hbm [resolvable:$true] %s187_s3 }
  0x62   :  { %s204_s9 = sshll.u32 %s194_s22, 4  ;;  %s1282_s28 = sshra.s32 %s188_s3, 4  ;;  %s1283_s28 = int_to_ptr.hbm [resolvable:$true] %s1282_s28  ;;  %s205_s9 = int_to_ptr.hbm [resolvable:$true] %s204_s9 }
  0x63   :  { %s1284_s29 = scalar_lea.hbm %s1283_s28, 1  ;;  %p1287_p3 = scmp.lt.s32.totalorder %s1283_s28, %s1569_s1 }
  0x64   :  { %p1285_p2 = scmp.ne.s32.totalorder %s1283_s28, %s1284_s29  ;;  %p1288_p4 = scmp.lt.s32.totalorder %s1469_s18, %s1284_s29 }
  0x66   :  { %p1289_p5 = por %p1288_p4, %p1287_p3 }
  0x68   :  { %p1290_p6 = pnand %p1289_p5, %p1285_p2 }
  0x6a   :  { %1293 = shalt.err (!%p1290_p6)  }
  0x6b   :  { %192 = dma.hbm_to_vmem [thread:$0]  %s188_s3, 16, %s190_s23, [#allocation3 + $0x6] }
  0x6c   :  { %s1391_s2 = smov [#allocation2 + $0x7]   ;;  %s1306_s24 = sshra.s32 %s205_s9, 4  ;;  %s1307_s24 = int_to_ptr.hbm [resolvable:$true] %s1306_s24 }
  0x6d   :  { %s206_s25 = sshll.u32 %s1391_s2, 4  ;;  %s1308_s8 = scalar_lea.hbm %s1307_s24, 1  ;;  %s207_s25 = int_to_ptr.vmem [resolvable:$true] %s206_s25 }
  0x6e   :  { %p1309_p7 = scmp.ne.s32.totalorder %s1307_s24, %s1308_s8  ;;  %p1311_p8 = scmp.lt.s32.totalorder %s1307_s24, %s1569_s1 }
  0x6f   :  { %p1312_p9 = scmp.lt.s32.totalorder %s1469_s18, %s1308_s8 }
  0x71   :  { %p1313_p10 = por %p1312_p9, %p1311_p8 }
  0x73   :  { %p1314_p11 = pnand %p1313_p10, %p1309_p7 }
  0x75   :  { %1317 = shalt.err (!%p1314_p11)  }
  0x76   :  { %209 = dma.hbm_to_vmem [thread:$0]  %s205_s9, 16, %s207_s25, [#allocation3 + $0x7] }
  0x77   :  { %1360 = dma.done.wait [#allocation3], 16 }
  0x78   :  { %1361 = vsyncadd [#allocation3], 4294967280 }
  0x79   :  { %1362 = dma.done.wait [#allocation3 + $0x1], 16 }
  0x7a   :  { %1363 = vsyncadd [#allocation3 + $0x1], 4294967280 }
  0x7b   :  { %1364 = dma.done.wait [#allocation3 + $0x2], 16 }
  0x7c   :  { %1365 = vsyncadd [#allocation3 + $0x2], 4294967280 }
  0x7d   :  { %1366 = dma.done.wait [#allocation3 + $0x3], 16 }
  0x7e   :  { %1367 = vsyncadd [#allocation3 + $0x3], 4294967280 }
  0x7f   :  { %1368 = dma.done.wait [#allocation3 + $0x4], 16 }
  0x80   :  { %1369 = vsyncadd [#allocation3 + $0x4], 4294967280 }
  0x81   :  { %1370 = dma.done.wait [#allocation3 + $0x5], 16 }
  0x82   :  { %1371 = vsyncadd [#allocation3 + $0x5], 4294967280 }
  0x83   :  { %1372 = dma.done.wait [#allocation3 + $0x6], 16 }
  0x84   :  { %1373 = vsyncadd [#allocation3 + $0x6], 4294967280 }
  0x85   :  { %1374 = dma.done.wait [#allocation3 + $0x7], 16 }
  0x86   :  { %1375 = vsyncadd [#allocation3 + $0x7], 4294967280  ;;  %v864_v0 = vld [vmem:[#allocation9 + $0xa8] sm:$0xf]  ;;  %v1002_v1 = vld [vmem:[#allocation9 + $0xb0] sm:$0xf0] }
  0x87   :  { %v960_v2 = vld [vmem:[#allocation11 + $0xa8] sm:$0xf]  ;;  %v865_v3 = vor.u32 %v1002_v1, %v864_v0  ;;  %v1026_v4 = vld [vmem:[#allocation11 + $0xb0] sm:$0xf0]  ;;  %v852_v5 = vld [vmem:[#allocation9 + $0x90] sm:$0xf] }
  0x88   :  { %v999_v6 = vld [vmem:[#allocation9 + $0x98] sm:$0xf0]  ;;  %v961_v7 = vor.u32 %v1026_v4, %v960_v2  ;;  %v948_v8 = vld [vmem:[#allocation11 + $0x90] sm:$0xf]  ;;  %v1001_v10 = vld [vmem:[#allocation9 + $0xac] sm:$0xf] }
  0x89   :  { %v1023_v9 = vld [vmem:[#allocation11 + $0x98] sm:$0xf0]  ;;  %398 = vmatpush.bf16.msra.mxu0 %v865_v3  ;;  %v853_v11 = vor.u32 %v999_v6, %v852_v5  ;;  %v866_v12 = vld [vmem:[#allocation9 + $0xb4] sm:$0xf0]  ;;  %v996_v16 = vld [vmem:[#allocation9 + $0x80] sm:$0xf0] }
  0x8a   :  { %598 = vmatpush.bf16.msra.mxu3 %v961_v7  ;;  %v949_v13 = vor.u32 %v1023_v9, %v948_v8  ;;  %v869_v14 = vor.u32 %v1001_v10, %v866_v12  ;;  %v840_v15 = vld [vmem:[#allocation9 + $0x78] sm:$0xf]  ;;  %v998_v17 = vld [vmem:[#allocation9 + $0x94] sm:$0xf]  ;;  %v1020_v19 = vld [vmem:[#allocation11 + $0x80] sm:$0xf0] }
  0x8b   :  { %v936_v18 = vld [vmem:[#allocation11 + $0x78] sm:$0xf]  ;;  %v854_v20 = vld [vmem:[#allocation9 + $0x9c] sm:$0xf0]  ;;  %v841_v22 = vor.u32 %v996_v16, %v840_v15  ;;  %v995_v23 = vld [vmem:[#allocation9 + $0x7c] sm:$0xf] }
  0x8c   :  { %411 = vmatpush.bf16.msra.mxu1 %v869_v14  ;;  %v857_v21 = vor.u32 %v998_v17, %v854_v20  ;;  %v842_v24 = vld [vmem:[#allocation9 + $0x84] sm:$0xf0]  ;;  %v937_v25 = vor.u32 %v1020_v19, %v936_v18  ;;  %v828_v26 = vld [vmem:[#allocation9 + $0x60] sm:$0xf]  ;;  %v993_v27 = vld [vmem:[#allocation9 + $0x68] sm:$0xf0] }
  0x8d   :  { %399 = vmatpush.bf16.msra.mxu0 %v853_v11  ;;  %v924_v28 = vld [vmem:[#allocation11 + $0x60] sm:$0xf]  ;;  %v1017_v29 = vld [vmem:[#allocation11 + $0x68] sm:$0xf0]  ;;  %v845_v30 = vor.u32 %v995_v23, %v842_v24  ;;  %v829_v31 = vor.u32 %v993_v27, %v828_v26  ;;  %v992_v32 = vld [vmem:[#allocation9 + $0x64] sm:$0xf] }
  0x8e   :  { %599 = vmatpush.bf16.msra.mxu3 %v949_v13  ;;  %v830_v33 = vld [vmem:[#allocation9 + $0x6c] sm:$0xf0]  ;;  %v925_v34 = vor.u32 %v1017_v29, %v924_v28  ;;  %v816_v35 = vld [vmem:[#allocation9 + $0x48] sm:$0xf]  ;;  %v990_v36 = vld [vmem:[#allocation9 + $0x50] sm:$0xf0] }
  0x8f   :  { %v912_v37 = vld [vmem:[#allocation11 + $0x48] sm:$0xf]  ;;  %v1014_v38 = vld [vmem:[#allocation11 + $0x50] sm:$0xf0]  ;;  %v833_v39 = vor.u32 %v992_v32, %v830_v33  ;;  %v817_v40 = vor.u32 %v990_v36, %v816_v35  ;;  %v804_v41 = vld [vmem:[#allocation9 + $0x30] sm:$0xf] }
  0x90   :  { %412 = vmatpush.bf16.msra.mxu1 %v857_v21  ;;  %v989_v42 = vld [vmem:[#allocation9 + $0x4c] sm:$0xf]  ;;  %v818_v43 = vld [vmem:[#allocation9 + $0x54] sm:$0xf0]  ;;  %v913_v44 = vor.u32 %v1014_v38, %v912_v37  ;;  %v987_v45 = vld [vmem:[#allocation9 + $0x38] sm:$0xf0] }
  0x91   :  { %400 = vmatpush.bf16.msra.mxu0 %v841_v22  ;;  %v872_v46 = vld [vmem:[#allocation9 + $0xb0] sm:$0xf]  ;;  %v1003_v47 = vld [vmem:[#allocation9 + $0xb8] sm:$0xf0]  ;;  %v821_v51 = vor.u32 %v989_v42, %v818_v43  ;;  %v860_v52 = vld [vmem:[#allocation9 + $0x98] sm:$0xf]  ;;  %v805_v54 = vor.u32 %v987_v45, %v804_v41 }
  0x92   :  { %600 = vmatpush.bf16.msra.mxu3 %v937_v25  ;;  %v900_v48 = vld [vmem:[#allocation11 + $0x30] sm:$0xf]  ;;  %v1011_v49 = vld [vmem:[#allocation11 + $0x38] sm:$0xf0]  ;;  %v873_v50 = vor.u32 %v1003_v47, %v872_v46  ;;  %v1000_v53 = vld [vmem:[#allocation9 + $0xa0] sm:$0xf0] }
  0x93   :  { %v986_v55 = vld [vmem:[#allocation9 + $0x34] sm:$0xf]  ;;  %v806_v56 = vld [vmem:[#allocation9 + $0x3c] sm:$0xf0]  ;;  %v861_v57 = vor.u32 %v1000_v53, %v860_v52  ;;  %v901_v58 = vor.u32 %v1011_v49, %v900_v48  ;;  %v792_v59 = vld [vmem:[#allocation9 + $0x18] sm:$0xf] }
  0x94   :  { %413 = vmatpush.bf16.msra.mxu1 %v845_v30  ;;  %424 = vmatpush.bf16.msra.mxu2 %v873_v50  ;;  %v984_v60 = vld [vmem:[#allocation9 + $0x20] sm:$0xf0]  ;;  %v848_v61 = vld [vmem:[#allocation9 + $0x80] sm:$0xf]  ;;  %v888_v62 = vld [vmem:[#allocation11 + $0x18] sm:$0xf]  ;;  %v809_v1 = vor.u32 %v986_v55, %v806_v56 }
  0x95   :  { %401 = vmatpush.bf16.msra.mxu0 %v829_v31  ;;  %v1008_v63 = vld [vmem:[#allocation11 + $0x20] sm:$0xf0]  ;;  %v997_v0 = vld [vmem:[#allocation9 + $0x88] sm:$0xf0]  ;;  %v780_v2 = vld [vmem:[#allocation9] sm:$0xf]  ;;  %v793_v3 = vor.u32 %v984_v60, %v792_v59 }
  0x96   :  { %601 = vmatpush.bf16.msra.mxu3 %v925_v34  ;;  %v981_v4 = vld [vmem:[#allocation9 + $0x8] sm:$0xf0]  ;;  %v983_v5 = vld [vmem:[#allocation9 + $0x1c] sm:$0xf]  ;;  %v794_v6 = vld [vmem:[#allocation9 + $0x24] sm:$0xf0]  ;;  %v849_v7 = vor.u32 %v997_v0, %v848_v61  ;;  %v889_v8 = vor.u32 %v1008_v63, %v888_v62 }
  0x97   :  { %v876_v9 = vld [vmem:[#allocation11] sm:$0xf]  ;;  %v836_v10 = vld [vmem:[#allocation9 + $0x68] sm:$0xf]  ;;  %v994_v11 = vld [vmem:[#allocation9 + $0x70] sm:$0xf0]  ;;  %v797_v15 = vor.u32 %v983_v5, %v794_v6  ;;  %v781_v17 = vor.u32 %v981_v4, %v780_v2 }
  0x98   :  { %414 = vmatpush.bf16.msra.mxu1 %v833_v39  ;;  %425 = vmatpush.bf16.msra.mxu2 %v861_v57  ;;  %v1005_v12 = vld [vmem:[#allocation11 + $0x8] sm:$0xf0]  ;;  %v962_v14 = vld [vmem:[#allocation11 + $0xb4] sm:$0xf0]  ;;  %v980_v18 = vld [vmem:[#allocation9 + $0x4] sm:$0xf]  ;;  %v837_v21 = vor.u32 %v994_v11, %v836_v10 }
  0x99   :  { %402 = vmatpush.bf16.msra.mxu0 %v817_v40  ;;  %v1025_v13 = vld [vmem:[#allocation11 + $0xac] sm:$0xf]  ;;  %v1544_v16 = vld [vmem:[#allocation6] sm:$0xff]  ;;  %v782_v19 = vld [vmem:[#allocation9 + $0xc] sm:$0xf0]  ;;  %v877_v22 = vor.u32 %v1005_v12, %v876_v9  ;;  %s697_s4 = sshll.u32 %s1575_s7, 4  ;;  %s698_s4 = int_to_ptr.hbm [resolvable:$true] %s697_s4 }
  0x9a   :  { %602 = vmatpush.bf16.msra.mxu3 %v913_v44  ;;  %v227_v20 = vld [vmem:[#allocation2] sm:$0xff]  ;;  %v965_v23 = vor.u32 %v1025_v13, %v962_v14  ;;  %v1027_v26 = vld [vmem:[#allocation11 + $0xb8] sm:$0xf0]  ;;  %v950_v27 = vld [vmem:[#allocation11 + $0x9c] sm:$0xf0]  ;;  %v785_v30 = vor.u32 %v980_v18, %v782_v19  ;;  %v1550_v32 = vpack.c.bf16 %v1544_v16, %v1544_v16 }
  0x9b   :  { %v1022_v24 = vld [vmem:[#allocation11 + $0x94] sm:$0xf]  ;;  %v968_v25 = vld [vmem:[#allocation11 + $0xb0] sm:$0xf]  ;;  %v991_v29 = vld [vmem:[#allocation9 + $0x58] sm:$0xf0]  ;;  %v1546_v31 = vpack.c.bf16 %v227_v20, %v227_v20 }
  0x9c   :  { %415 = vmatpush.bf16.msra.mxu1 %v821_v51  ;;  %426 = vmatpush.bf16.msra.mxu2 %v849_v7  ;;  %v824_v28 = vld [vmem:[#allocation9 + $0x50] sm:$0xf]  ;;  %v969_v33 = vor.u32 %v1027_v26, %v968_v25  ;;  %v1019_v34 = vld [vmem:[#allocation11 + $0x7c] sm:$0xf]  ;;  %v953_v35 = vor.u32 %v1022_v24, %v950_v27  ;;  %v956_v36 = vld [vmem:[#allocation11 + $0x98] sm:$0xf] }
  0x9d   :  { %403 = vmatpush.bf16.msra.mxu0 %v805_v54  ;;  %v1024_v37 = vld [vmem:[#allocation11 + $0xa0] sm:$0xf0]  ;;  %v825_v38 = vor.u32 %v991_v29, %v824_v28  ;;  %v938_v39 = vld [vmem:[#allocation11 + $0x84] sm:$0xf0]  ;;  %v812_v40 = vld [vmem:[#allocation9 + $0x38] sm:$0xf] }
  0x9e   :  { %603 = vmatpush.bf16.msra.mxu3 %v901_v58  ;;  %v988_v41 = vld [vmem:[#allocation9 + $0x40] sm:$0xf0]  ;;  %v957_v42 = vor.u32 %v1024_v37, %v956_v36  ;;  %v941_v43 = vor.u32 %v1019_v34, %v938_v39  ;;  %v944_v45 = vld [vmem:[#allocation11 + $0x80] sm:$0xf]  ;;  %v1021_v46 = vld [vmem:[#allocation11 + $0x88] sm:$0xf0] }
  0x9f   :  { %v1016_v44 = vld [vmem:[#allocation11 + $0x64] sm:$0xf]  ;;  %v813_v47 = vor.u32 %v988_v41, %v812_v40  ;;  %v926_v48 = vld [vmem:[#allocation11 + $0x6c] sm:$0xf0]  ;;  %v800_v49 = vld [vmem:[#allocation9 + $0x20] sm:$0xf]  ;;  %v945_v51 = vor.u32 %v1021_v46, %v944_v45 }
  0xa0   :  { %416 = vmatpush.bf16.msra.mxu1 %v809_v1  ;;  %427 = vmatpush.bf16.msra.mxu2 %v837_v21  ;;  %v985_v50 = vld [vmem:[#allocation9 + $0x28] sm:$0xf0]  ;;  %v929_v52 = vor.u32 %v1016_v44, %v926_v48  ;;  %v932_v54 = vld [vmem:[#allocation11 + $0x68] sm:$0xf]  ;;  %v1018_v55 = vld [vmem:[#allocation11 + $0x70] sm:$0xf0] }
  0xa1   :  { %404 = vmatpush.bf16.msra.mxu0 %v793_v3  ;;  %v1013_v53 = vld [vmem:[#allocation11 + $0x4c] sm:$0xf]  ;;  %v801_v56 = vor.u32 %v985_v50, %v800_v49  ;;  %v914_v57 = vld [vmem:[#allocation11 + $0x54] sm:$0xf0]  ;;  %v788_v58 = vld [vmem:[#allocation9 + $0x8] sm:$0xf]  ;;  %v933_v60 = vor.u32 %v1018_v55, %v932_v54 }
  0xa2   :  { %604 = vmatpush.bf16.msra.mxu3 %v889_v8  ;;  %v982_v59 = vld [vmem:[#allocation9 + $0x10] sm:$0xf0]  ;;  %v917_v61 = vor.u32 %v1013_v53, %v914_v57  ;;  %v920_v62 = vld [vmem:[#allocation11 + $0x50] sm:$0xf]  ;;  %v1015_v63 = vld [vmem:[#allocation11 + $0x58] sm:$0xf0] }
  0xa3   :  { %v789_v0 = vor.u32 %v982_v59, %v788_v58  ;;  %v1010_v1 = vld [vmem:[#allocation11 + $0x34] sm:$0xf]  ;;  %v902_v2 = vld [vmem:[#allocation11 + $0x3c] sm:$0xf0]  ;;  %v921_v3 = vor.u32 %v1015_v63, %v920_v62  ;;  %v908_v5 = vld [vmem:[#allocation11 + $0x38] sm:$0xf] }
  0xa4   :  { %417 = vmatpush.bf16.msra.mxu1 %v797_v15  ;;  %428 = vmatpush.bf16.msra.mxu2 %v825_v38  ;;  %v905_v4 = vor.u32 %v1010_v1, %v902_v2  ;;  %v1012_v6 = vld [vmem:[#allocation11 + $0x40] sm:$0xf0]  ;;  %v1007_v7 = vld [vmem:[#allocation11 + $0x1c] sm:$0xf]  ;;  %v890_v8 = vld [vmem:[#allocation11 + $0x24] sm:$0xf0] }
  0xa5   :  { %405 = vmatpush.bf16.msra.mxu0 %v781_v17  ;;  %v909_v9 = vor.u32 %v1012_v6, %v908_v5  ;;  %v893_v10 = vor.u32 %v1007_v7, %v890_v8  ;;  %v896_v11 = vld [vmem:[#allocation11 + $0x20] sm:$0xf]  ;;  %v1009_v12 = vld [vmem:[#allocation11 + $0x28] sm:$0xf0]  ;;  %v1004_v13 = vld [vmem:[#allocation11 + $0x4] sm:$0xf] }
  0xa6   :  { %605 = vmatpush.bf16.msra.mxu3 %v877_v22  ;;  %v878_v14 = vld [vmem:[#allocation11 + $0xc] sm:$0xf0]  ;;  %v897_v15 = vor.u32 %v1009_v12, %v896_v11  ;;  %v884_v18 = vld [vmem:[#allocation11 + $0x8] sm:$0xf]  ;;  %v1006_v19 = vld [vmem:[#allocation11 + $0x10] sm:$0xf0] }
  0xa7   :  { %v881_v17 = vor.u32 %v1004_v13, %v878_v14  ;;  %v885_v20 = vor.u32 %v1006_v19, %v884_v18  ;;  %v262_v21 = vld [vmem:[%s1573_s5] sm:$0x7] }
  0xa8   :  { %418 = vmatpush.bf16.msra.mxu1 %v785_v30  ;;  %406 = vmatmul.bf16.vlgmr.msra.gmra.mxu0 %v1546_v31  ;;  %v264_v22 = vperm.slane %v262_v21, 0  ;;  %v1043_v50 = vld [vmem:[%s1574_s6] ss:$0 sm:$0xff]  ;;  %v266_v57 = vperm.slane %v262_v21, 2  ;;  %s1392_s6 = smov [#allocation12]  }
  0xa9   :  { %611 = vmatpush.bf16.msrb.mxu0 %v965_v23  ;;  %606 = vmatmul.bf16.vlgmr.msra.gmra.mxu3 %v1550_v32  ;;  %s695_s0 = sshll.u32 %s1392_s6, 4  ;;  %s696_s0 = int_to_ptr.vmem [resolvable:$true] %s695_s0 }
  0xaa   :  { %429 = vmatpush.bf16.msra.mxu2 %v813_v47 }
  0xab   :  { %419 = vmatmul.bf16.vlgmr.msra.gmra.mxu1 %v1546_v31 }
  0xac   :  { %624 = vmatpush.bf16.msrb.mxu1 %v969_v33 }
  0xad   :  { %612 = vmatpush.bf16.msrb.mxu0 %v953_v35  ;;  %v265_v35 = vperm.slane %v262_v21, 1 }
  0xae   :  { %430 = vmatpush.bf16.msra.mxu2 %v801_v56 }
  0xb0   :  { %625 = vmatpush.bf16.msrb.mxu1 %v957_v42 }
  0xb1   :  { %613 = vmatpush.bf16.msrb.mxu0 %v941_v43 }
  0xb2   :  { %431 = vmatpush.bf16.msra.mxu2 %v789_v0 }
  0xb4   :  { %626 = vmatpush.bf16.msrb.mxu1 %v945_v51 }
  0xb5   :  { %614 = vmatpush.bf16.msrb.mxu0 %v929_v52  ;;  %432 = vmatmul.bf16.vlgmr.msra.gmra.mxu2 %v1546_v31 }
  0xb8   :  { %627 = vmatpush.bf16.msrb.mxu1 %v933_v60 }
  0xb9   :  { %615 = vmatpush.bf16.msrb.mxu0 %v917_v61 }
  0xbc   :  { %628 = vmatpush.bf16.msrb.mxu1 %v921_v3 }
  0xbd   :  { %616 = vmatpush.bf16.msrb.mxu0 %v905_v4 }
  0xc0   :  { %629 = vmatpush.bf16.msrb.mxu1 %v909_v9 }
  0xc1   :  { %617 = vmatpush.bf16.msrb.mxu0 %v893_v10 }
  0xc4   :  { %630 = vmatpush.bf16.msrb.mxu1 %v897_v15 }
  0xc5   :  { %618 = vmatpush.bf16.msrb.mxu0 %v881_v17 }
  0xc8   :  { %619 = vmatmul.bf16.vlgmr.msrb.gmra.mxu0 %v1550_v32  ;;  %631 = vmatpush.bf16.msrb.mxu1 %v885_v20 }
  0xcb   :  { %632 = vmatmul.bf16.vlgmr.msrb.gmra.mxu1 %v1550_v32 }
 0x125   :  { %v407_v23 = vpop.f32.mrf.mxu0 }
 0x126   :  { %v408_v25 = vadd.f32 %v407_v23, %v264_v22 }
 0x128   :  { %v420_v24 = vpop.f32.mrf.mxu1 }
 0x129   :  { %v421_v36 = vadd.f32 %v420_v24, %v265_v35 }
 0x12c   :  { %v607_v26 = vpop.f32.mrf.mxu3 }
 0x12d   :  { %v637_v27 = vadd.f32 %v607_v26, %v408_v25  ;;  %v409_v28 = vpop.f32.mrf.mxu0 }
 0x12f   :  { %v970_v29 = vmul.f32 -1.442695, %v637_v27 }
 0x130   :  { %v422_v30 = vpop.f32.mrf.mxu1 }
 0x131   :  { %1044 = vpow2.f32 %v970_v29 }
 0x134   :  { %v609_v31 = vpop.f32.mrf.mxu3 }
 0x137   :  { %v1045_v33 = vpop.eup %1044 }
 0x138   :  { %v641_v34 = vadd.f32 1.0, %v1045_v33  ;;  %v433_v32 = vpop.f32.mrf.mxu2 }
 0x139   :  { %v434_v60 = vadd.f32 %v433_v32, %v266_v57 }
 0x13a   :  { %1046 = vrcp.f32 %v641_v34  ;;  %vm647_vm0 = vweird.f32 %v641_v34  ;;  %v653_v48 = vand.u32 2147483648, %v641_v34  ;;  %v651_v49 = vand.u32 2147483647, %v641_v34 }
 0x13c   :  { %v654_v55 = vor.u32 1.1754944e-38, %v653_v48  ;;  %vm652_vm3 = vcmp.eq.f32.partialorder %v651_v49, 8.507059e+37 }
 0x140   :  { %v1047_v37 = vpop.eup %1046  ;;  %v435_v42 = vpop.f32.mrf.mxu2 }
 0x141   :  { %v643_v38 = vmul.f32 %v1047_v37, %v641_v34  ;;  %vm648_vm1 = vweird.f32 %v1047_v37 }
 0x142   :  { %vm649_vm2 = vmor %vm647_vm0, %vm648_vm1 }
 0x143   :  { %v644_v41 = vsub.f32 1.0, %v643_v38 }
 0x145   :  { %v620_v39 = vpop.f32.mrf.mxu0  ;;  %v645_v45 = vmul.f32 %v1047_v37, %v644_v41 }
 0x146   :  { %v657_v40 = vadd.f32 %v620_v39, %v421_v36 }
 0x147   :  { %v646_v46 = vadd.f32 %v1047_v37, %v645_v45 }
 0x148   :  { %v971_v43 = vmul.f32 -1.442695, %v657_v40  ;;  %v633_v44 = vpop.f32.mrf.mxu1 }
 0x149   :  { %v650_v54 = vsel %vm649_vm2, %v1047_v37, %v646_v46  ;;  %v681_v56 = vadd.f32 %v1043_v50, %v633_v44 }
 0x14a   :  { %1048 = vpow2.f32 %v971_v43  ;;  %v655_v58 = vsel %vm652_vm3, %v654_v55, %v650_v54 }
 0x14b   :  { %v682_v59 = vmul.f32 %v681_v56, %v655_v58 }
 0x14d   :  { %v622_v47 = vpop.f32.mrf.mxu0  ;;  %v683_v63 = vadd.f32 %v682_v59, %v434_v60 }
 0x150   :  { %v1049_v51 = vpop.eup %1048  ;;  %v635_v52 = vpop.f32.mrf.mxu1 }
 0x151   :  { %v661_v53 = vadd.f32 1.0, %v1049_v51 }
 0x153   :  { %1050 = vrcp.f32 %v661_v53  ;;  %v673_v1 = vand.u32 2147483648, %v661_v53  ;;  %v671_v3 = vand.u32 2147483647, %v661_v53  ;;  %vm667_vm5 = vweird.f32 %v661_v53 }
 0x154   :  { %1052 = vtanh.f32 %v683_v63 }
 0x155   :  { %v674_v5 = vor.u32 1.1754944e-38, %v673_v1  ;;  %vm672_vm7 = vcmp.eq.f32.partialorder %v671_v3, 8.507059e+37 }
 0x159   :  { %v1051_v61 = vpop.eup %1050 }
 0x15a   :  { %v663_v62 = vmul.f32 %v1051_v61, %v661_v53  ;;  %vm668_vm4 = vweird.f32 %v1051_v61  ;;  %v1053_v9 = vpop.eup %1052 }
 0x15b   :  { %vm669_vm6 = vmor %vm667_vm5, %vm668_vm4 }
 0x15c   :  { %v664_v0 = vsub.f32 1.0, %v663_v62 }
 0x15e   :  { %v665_v2 = vmul.f32 %v1051_v61, %v664_v0 }
 0x160   :  { %v666_v4 = vadd.f32 %v1051_v61, %v665_v2 }
 0x162   :  { %v670_v6 = vsel %vm669_vm6, %v1051_v61, %v666_v4 }
 0x163   :  { %v675_v7 = vsel %vm672_vm7, %v674_v5, %v670_v6 }
 0x164   :  { %v685_v8 = vsub.f32 1.0, %v675_v7  ;;  %v687_v11 = vmul.f32 %v675_v7, %v1544_v16 }
 0x166   :  { %v686_v10 = vmul.f32 %v1053_v9, %v685_v8 }
 0x168   :  { %v688_v12 = vadd.f32 %v687_v11, %v686_v10 }
 0x16a   :  { %689 = vst [vmem:[#allocation12] sm:$0xff] %v688_v12 }
 0x16b   :  { %700 = dma.vmem_to_hbm [thread:$0]  %s696_s0, 128, %s698_s4, [#allocation8]  }
 0x16c   :  { %1376 = dma.done.wait [#allocation8], 128  }
 0x16d   :  { %1377 = vsyncadd [#allocation8], 4294967168 }
 0x16e   :  { %705 = vsyncpa [#allocation7], 1 }
 0x16f   :  { %706 = vsyncpa [#allocation10], 1 }
 0x170   :  { %707 = vsyncpa [#allocation8], 1 }
 0x171   :  { %708 = vsyncmov [#allocation3] }
 0x174   :  { %s709_s27 = vpop.sfrf %708 }
 0x175   :  { %p972_p12 = scmp.ne.s32.totalorder %s709_s27, 0 }
 0x177   :  { %713 = shalt.err (%p972_p12)  }
 0x178   :  { %715 = vsyncmov [#allocation3 + $0x1] }
 0x17b   :  { %s716_s13 = vpop.sfrf %715 }
 0x17c   :  { %p973_p13 = scmp.ne.s32.totalorder %s716_s13, 0 }
 0x17e   :  { %720 = shalt.err (%p973_p13)  }
 0x17f   :  { %722 = vsyncmov [#allocation3 + $0x2] }
 0x182   :  { %s723_s7 = vpop.sfrf %722 }
 0x183   :  { %p974_p0 = scmp.ne.s32.totalorder %s723_s7, 0 }
 0x185   :  { %727 = shalt.err (%p974_p0)  }
 0x186   :  { %729 = vsyncmov [#allocation3 + $0x3] }
 0x189   :  { %s730_s15 = vpop.sfrf %729 }
 0x18a   :  { %p975_p1 = scmp.ne.s32.totalorder %s730_s15, 0 }
 0x18c   :  { %734 = shalt.err (%p975_p1)  }
 0x18d   :  { %736 = vsyncmov [#allocation3 + $0x4] }
 0x190   :  { %s737_s16 = vpop.sfrf %736 }
 0x191   :  { %p976_p2 = scmp.ne.s32.totalorder %s737_s16, 0 }
 0x193   :  { %741 = shalt.err (%p976_p2)  }
 0x194   :  { %743 = vsyncmov [#allocation3 + $0x5] }
 0x197   :  { %s744_s17 = vpop.sfrf %743 }
 0x198   :  { %p977_p3 = scmp.ne.s32.totalorder %s744_s17, 0 }
 0x19a   :  { %748 = shalt.err (%p977_p3)  }
 0x19b   :  { %750 = vsyncmov [#allocation3 + $0x6] }
 0x19e   :  { %s751_s19 = vpop.sfrf %750 }
 0x19f   :  { %p978_p4 = scmp.ne.s32.totalorder %s751_s19, 0 }
 0x1a1   :  { %755 = shalt.err (%p978_p4)  }
 0x1a2   :  { %757 = vsyncmov [#allocation3 + $0x7] }
 0x1a5   :  { %s758_s3 = vpop.sfrf %757 }
 0x1a6   :  { %p979_p5 = scmp.ne.s32.totalorder %s758_s3, 0 }
 0x1a8   :  { %762 = shalt.err (%p979_p5)  }

</bundles_post_ra>
